<compile_context>
chip_gen: v5e
topology: v5e:2x2
jax: 0.10.0
libtpu: 0.0.40
codegen_flags: <defaults>
</compile_context>

<pallas_src>
import functools

import jax
import jax.numpy as jnp
import numpy as np
from jax.experimental import pallas as pl
from jax.experimental.pallas import tpu as pltpu


def _cond_attn_kernel(x_ref, cp_ref,
                      w0_ref, b0_ref,
                      w1a_ref,
                      w2_ref, b2_ref,
                      o_ref, *, mode, hc_chunk):
    """One (C, TN) tile of pixels: all three 1x1 convs + ReLUs + residual."""
    x = x_ref[...]                                   # (C, TN), streamed dtype
    cdt = w0_ref.dtype                               # MXU-input dtype (f32/bf16)

    # self.conv : Conv2d(C, C, 1) + ReLU   (f32 accumulate on the MXU)
    x1 = jnp.dot(w0_ref[...], x.astype(cdt),
                 preferred_element_type=jnp.float32) + b0_ref[...]
    x1 = jnp.maximum(x1, 0.0)                        # (C, TN) f32
    x1c = x1.astype(cdt)

    hc = w1a_ref.shape[0]
    if hc_chunk is None or hc_chunk >= hc:
        # self.conv1[0:2] : Conv2d(2C, HC, 1) + ReLU on cat([x1, cond]);
        # the cond half is the per-batch constant cp_ref (HC, 1).
        h = jnp.maximum(jnp.dot(w1a_ref[...], x1c,
                                preferred_element_type=jnp.float32)
                        + cp_ref[...], 0.0)          # (HC, TN) f32
        # self.conv1[2] : Conv2d(HC, C, 1)
        out = jnp.dot(w2_ref[...], h.astype(cdt),
                      preferred_element_type=jnp.float32) + b2_ref[...]
    else:
        # Chunk the hidden dim: never materialize the full (HC, TN) f32 tile.
        out = jnp.zeros(x.shape, jnp.float32)
        for j in range(hc // hc_chunk):
            r = pl.ds(j * hc_chunk, hc_chunk)        # static slice, zero cost
            hj = jnp.maximum(jnp.dot(w1a_ref[r, :], x1c,
                                     preferred_element_type=jnp.float32)
                             + cp_ref[r, :], 0.0)    # (hc_chunk, TN) f32
            out = out + jnp.dot(w2_ref[:, r], hj.astype(cdt),
                                preferred_element_type=jnp.float32)
        out = out + b2_ref[...]

    if mode == 'add':
        out = out + x.astype(jnp.float32)
    elif mode == 'mu':
        out = out * x.astype(jnp.float32)
    # mode == 'drop': out unchanged
    o_ref[...] = out.astype(o_ref.dtype)


def condition_attention_layer(x_nchw, cond_nc11, params, *, mode='add',
                              tn=None, hc_chunk='auto'):
    """x_nchw: (b, c, h, w).  cond_nc11: (b, c, 1, 1)."""
    assert mode in ('add', 'mu', 'drop')
    b, c, h, w = x_nchw.shape
    hw = h * w
    hc = params['w1a'].shape[0]

    x_dtype = jnp.dtype(x_nchw.dtype)
    xbytes = x_dtype.itemsize
    # Compute (MXU-input) dtype: bf16 streams get native bf16 MXU operands.
    cdt = jnp.bfloat16 if x_dtype == jnp.dtype(jnp.bfloat16) else jnp.float32
    cbytes = jnp.dtype(cdt).itemsize

    w0 = params['w0'].astype(cdt)
    w1a = params['w1a'].astype(cdt)
    w2 = params['w2'].astype(cdt)
    b0 = params['b0'].astype(jnp.float32)
    b2 = params['b2'].astype(jnp.float32)

    # Channels-major pixel matrix — pure reshape, no transpose / HBM copy.
    x_cm = x_nchw.reshape(b, c, hw)

    # Fold the condition branch into a tiny per-batch constant (b, HC, 1).
    cond_vec = cond_nc11.reshape(b, c).astype(jnp.float32)
    cond_proj = (cond_vec @ params['w1b'].astype(jnp.float32).T
                 + params['b1'].astype(jnp.float32)[:, 0]).reshape(b, hc, 1)

    # Hidden-dim chunking (only worthwhile for large HC).
    if hc_chunk == 'auto':
        if hc >= 512 and hc % 256 == 0:
            hc_chunk = 256
        elif hc >= 512 and hc % 128 == 0:
            hc_chunk = 128
        else:
            hc_chunk = None
    if hc_chunk is not None:
        assert hc % hc_chunk == 0, "hc_chunk must divide hidden_channel"
    hc_eff = hc if hc_chunk is None else hc_chunk

    # Per-generation VMEM budget (~80% of physical: ~51 MiB v7x, ~102 MiB v6e).
    try:
        vmem_cap = int(pltpu.get_tpu_info().vmem_capacity_bytes)
    except Exception:
        vmem_cap = 64 << 20
    vmem_budget = int(vmem_cap * 0.8)

    def vmem_usage(tn_):
        stream = 2 * 2 * c * tn_ * xbytes                 # x/out, double-buffered
        inter = (c + hc_eff) * tn_ * 4                    # x1 + h f32 live tiles
        weights = 2 * ((c * c + 2 * c * hc) * cbytes + (2 * c + hc) * 4)
        return stream + inter + weights + (4 << 20)       # compiler scratch slack

    # Pixel tile: byte-targeted (~2 MiB streamed x tile), multiple of 128 (or
    # the full extent), shrunk to fit the VMEM budget.
    if tn is None:
        if hw <= 256:
            tn = hw
        else:
            target = 2 << 20
            tn = max(128, min((target // (c * xbytes)) // 128 * 128, hw))
            while tn > 128 and tn % 128 == 0 and vmem_usage(tn) > vmem_budget:
                tn -= 128
            if tn >= hw:
                tn = hw
        # Megacore: guarantee >= 2 parallel grid steps when b == 1 (v7x: 2 TCs).
        if b == 1 and tn >= hw and hw >= 256:
            tn = max(128, ((hw // 2) // 128) * 128)
    assert tn == hw or tn % 128 == 0, \
        "pixel tile must be a multiple of 128 or the full extent"
    grid = (b, pl.cdiv(hw, tn))

    vmem_limit = int(min(max(2 * vmem_usage(tn), 32 << 20), vmem_budget))

    def full(arr):
        return pl.BlockSpec(arr.shape, lambda bi, ni: (0,) * arr.ndim)

    x_spec = pl.BlockSpec((None, c, tn), lambda bi, ni: (bi, 0, ni))
    cp_spec = pl.BlockSpec((None, hc, 1), lambda bi, ni: (bi, 0, 0))
    out_spec = pl.BlockSpec((None, c, tn), lambda bi, ni: (bi, 0, ni))

    # Advisory cost estimate, in sync with the actual streamed element sizes.
    flops = 2 * b * hw * (c * c + 2 * c * hc)
    bytes_accessed = (2 * b * hw * c * xbytes + b * hc * 4
                      + (c * c + 2 * c * hc) * cbytes + (2 * c + hc) * 4)
    cost = pl.CostEstimate(flops=int(flops), transcendentals=0,
                           bytes_accessed=int(bytes_accessed))

    out_cm = pl.pallas_call(
        functools.partial(_cond_attn_kernel, mode=mode, hc_chunk=hc_chunk),
        out_shape=jax.ShapeDtypeStruct((b, c, hw), x_dtype),
        grid_spec=pltpu.PrefetchScalarGridSpec(
            num_scalar_prefetch=0,
            grid=grid,
            in_specs=[
                x_spec,          # x tile            (C, TN)
                cp_spec,         # cond projection   (HC, 1)
                full(w0),        # (C, C)
                full(b0),        # (C, 1)
                full(w1a),       # (HC, C)
                full(w2),        # (C, HC)
                full(b2),        # (C, 1)
            ],
            out_specs=out_spec,
        ),
        compiler_params=pltpu.CompilerParams(
            dimension_semantics=("parallel", "parallel"),
            vmem_limit_bytes=vmem_limit),
        cost_estimate=cost,
    )(x_cm, cond_proj, w0, b0, w1a, w2, b2)

    return out_cm.reshape(b, c, h, w)


def init_params(key, in_channel, hidden_channel=None, dtype=jnp.float32):
    """Deterministic synthetic weights matching the PyTorch module's shapes."""
    if hidden_channel is None:
        hidden_channel = in_channel * 2
    c, hc = in_channel, hidden_channel
    ks = jax.random.split(key, 6)
    # PyTorch Conv2d weights are (out, in, 1, 1); channels-major uses them
    # directly as (out, in) matrices.
    w0 = jax.random.normal(ks[0], (c, c), dtype) * 0.1          # conv
    b0 = jax.random.normal(ks[1], (c, 1), dtype) * 0.1
    w1 = jax.random.normal(ks[2], (hc, 2 * c), dtype) * 0.1     # conv1[0]
    b1 = jax.random.normal(ks[3], (hc, 1), dtype) * 0.1
    w2 = jax.random.normal(ks[4], (c, hc), dtype) * 0.1         # conv1[2]
    b2 = jax.random.normal(ks[5], (c, 1), dtype) * 0.1
    return {
        'w0': w0, 'b0': b0,
        'w1a': w1[:, :c], 'w1b': w1[:, c:], 'b1': b1,
        'w2': w2, 'b2': b2,
    }


def reference_jax(x_nchw, cond_nc11, params, mode='add'):
    """Pure-JAX f32 reference mirroring the PyTorch forward pass (with the cat)."""
    b, c, h, w = x_nchw.shape
    x = jnp.transpose(x_nchw, (0, 2, 3, 1)).astype(jnp.float32)   # (b,h,w,c)
    cond = jnp.broadcast_to(jnp.transpose(cond_nc11, (0, 2, 3, 1)),
                            (b, h, w, c)).astype(jnp.float32)
    x1 = jax.nn.relu(x @ params['w0'].T + params['b0'][:, 0])
    cat = jnp.concatenate([x1, cond], axis=-1)
    w1 = jnp.concatenate([params['w1a'], params['w1b']], axis=1)  # (hc, 2c)
    hdn = jax.nn.relu(cat @ w1.T + params['b1'][:, 0])
    out = hdn @ params['w2'].T + params['b2'][:, 0]
    if mode == 'add':
        out = out + x
    elif mode == 'mu':
        out = out * x
    return jnp.transpose(out, (0, 3, 1, 2))


if __name__ == "__main__":
    key = jax.random.PRNGKey(0)
    k_x, k_c, k_p = jax.random.split(key, 3)

    # --- f32 parity, all modes ------------------------------------------------
    B, C, H, W = 2, 4, 16, 16
    x = jax.random.normal(k_x, (B, C, H, W), jnp.float32)
    condition = jax.random.normal(k_c, (B, C, 1, 1), jnp.float32)
    params = init_params(k_p, in_channel=C)
    for mode in ('add', 'mu', 'drop'):
        out = jax.block_until_ready(
            condition_attention_layer(x, condition, params, mode=mode))
        ref = reference_jax(x, condition, params, mode=mode)
        np.testing.assert_allclose(np.asarray(out), np.asarray(ref),
                                   rtol=1e-5, atol=1e-5)

    # --- multi-tile pixel axis (exercises the pixel grid dimension) ------------
    B2, C2, H2, W2 = 2, 4, 32, 32
    x2 = jax.random.normal(k_x, (B2, C2, H2, W2), jnp.float32)
    cond2 = jax.random.normal(k_c, (B2, C2, 1, 1), jnp.float32)
    params2 = init_params(k_p, in_channel=C2)
    out2 = jax.block_until_ready(
        condition_attention_layer(x2, cond2, params2, mode='add', tn=256))
    ref2 = reference_jax(x2, cond2, params2, mode='add')
    np.testing.assert_allclose(np.asarray(out2), np.asarray(ref2),
                               rtol=1e-5, atol=1e-5)

    # --- bf16 streaming (halves HBM bytes; looser tolerance vs f32 reference) --
    x_bf = x.astype(jnp.bfloat16)
    out_bf = jax.block_until_ready(
        condition_attention_layer(x_bf, condition, params, mode='add'))
    ref_bf = reference_jax(x_bf.astype(jnp.float32), condition, params, mode='add')
    np.testing.assert_allclose(np.asarray(out_bf.astype(jnp.float32)),
                               np.asarray(ref_bf), rtol=5e-2, atol=5e-2)

    # --- HC-chunked path + b==1 pixel-axis split (megacore) --------------------
    B3, C3, H3, W3, HC3 = 1, 8, 16, 16, 256
    x3 = jax.random.normal(k_x, (B3, C3, H3, W3), jnp.float32)
    cond3 = jax.random.normal(k_c, (B3, C3, 1, 1), jnp.float32)
    params3 = init_params(k_p, in_channel=C3, hidden_channel=HC3)
    out3 = jax.block_until_ready(
        condition_attention_layer(x3, cond3, params3, mode='mu', hc_chunk=128))
    ref3 = reference_jax(x3, cond3, params3, mode='mu')
    np.testing.assert_allclose(np.asarray(out3), np.asarray(ref3),
                               rtol=1e-4, atol=1e-4)

    print("KERNEL_OK")
</pallas_src>

<mosaic_0001>
module attributes {stable_mosaic.version = 11 : i64} {
  func.func @_cond_attn_kernel(%arg0: i32, %arg1: i32, %arg2: memref<1x4x256xf32, #tpu.memory_space<vmem>>, %arg3: memref<1x8x1xf32, #tpu.memory_space<vmem>>, %arg4: memref<4x4xf32, #tpu.memory_space<vmem>>, %arg5: memref<4x1xf32, #tpu.memory_space<vmem>>, %arg6: memref<8x4xf32, #tpu.memory_space<vmem>>, %arg7: memref<4x8xf32, #tpu.memory_space<vmem>>, %arg8: memref<4x1xf32, #tpu.memory_space<vmem>>, %arg9: memref<1x4x256xf32, #tpu.memory_space<vmem>>) attributes {dimension_semantics = [#tpu.dimension_semantics<parallel>, #tpu.dimension_semantics<parallel>], iteration_bounds = array<i64: 2, 1>, scalar_prefetch = 0 : i64, scratch_operands = 0 : i64, tpu.core_type = #tpu.core_type<tc>, window_params = [{transform_indices = @transform_0, window_bounds = array<i64: 1, 4, 256>}, {transform_indices = @transform_1, window_bounds = array<i64: 1, 8, 1>}, {pipeline_mode = #tpu.pipeline_mode<synchronous>, transform_indices = @transform_2, window_bounds = array<i64: 4, 4>}, {pipeline_mode = #tpu.pipeline_mode<synchronous>, transform_indices = @transform_3, window_bounds = array<i64: 4, 1>}, {pipeline_mode = #tpu.pipeline_mode<synchronous>, transform_indices = @transform_4, window_bounds = array<i64: 8, 4>}, {pipeline_mode = #tpu.pipeline_mode<synchronous>, transform_indices = @transform_5, window_bounds = array<i64: 4, 8>}, {pipeline_mode = #tpu.pipeline_mode<synchronous>, transform_indices = @transform_6, window_bounds = array<i64: 4, 1>}, {transform_indices = @transform_7, window_bounds = array<i64: 1, 4, 256>}]} {
    %c0 = arith.constant 0 : index
    %c0_0 = arith.constant 0 : index
    %c0_1 = arith.constant 0 : index
    %0 = vector.load %arg2[%c0, %c0_0, %c0_1] : memref<1x4x256xf32, #tpu.memory_space<vmem>>, vector<1x4x256xf32>
    %1 = vector.shape_cast %0 : vector<1x4x256xf32> to vector<4x256xf32>
    %c0_2 = arith.constant 0 : index
    %c0_3 = arith.constant 0 : index
    %2 = vector.load %arg4[%c0_2, %c0_3] : memref<4x4xf32, #tpu.memory_space<vmem>>, vector<4x4xf32>
    %cst = arith.constant dense<0.000000e+00> : vector<4x256xf32>
    %3 = tpu.matmul %2, %1, %cst {dimension_numbers = #tpu.dot_dimension_numbers<[1], [0], [0], [1], [0, 0, 1, 1], [], []>} : vector<4x4xf32>, vector<4x256xf32>, vector<4x256xf32> -> vector<4x256xf32>
    %c0_4 = arith.constant 0 : index
    %c0_5 = arith.constant 0 : index
    %4 = vector.load %arg5[%c0_4, %c0_5] : memref<4x1xf32, #tpu.memory_space<vmem>>, vector<4x1xf32>
    %5 = vector.broadcast %4 : vector<4x1xf32> to vector<4x256xf32>
    %6 = arith.addf %3, %5 : vector<4x256xf32>
    %cst_6 = arith.constant 0.000000e+00 : f32
    %7 = vector.broadcast %cst_6 : f32 to vector<4x256xf32>
    %8 = arith.maximumf %6, %7 : vector<4x256xf32>
    %c0_7 = arith.constant 0 : index
    %c0_8 = arith.constant 0 : index
    %9 = vector.load %arg6[%c0_7, %c0_8] : memref<8x4xf32, #tpu.memory_space<vmem>>, vector<8x4xf32>
    %cst_9 = arith.constant dense<0.000000e+00> : vector<8x256xf32>
    %10 = tpu.matmul %9, %8, %cst_9 {dimension_numbers = #tpu.dot_dimension_numbers<[1], [0], [0], [1], [0, 0, 1, 1], [], []>} : vector<8x4xf32>, vector<4x256xf32>, vector<8x256xf32> -> vector<8x256xf32>
    %c0_10 = arith.constant 0 : index
    %c0_11 = arith.constant 0 : index
    %c0_12 = arith.constant 0 : index
    %11 = vector.load %arg3[%c0_10, %c0_11, %c0_12] : memref<1x8x1xf32, #tpu.memory_space<vmem>>, vector<1x8x1xf32>
    %12 = vector.shape_cast %11 : vector<1x8x1xf32> to vector<8x1xf32>
    %13 = vector.broadcast %12 : vector<8x1xf32> to vector<8x256xf32>
    %14 = arith.addf %10, %13 : vector<8x256xf32>
    %cst_13 = arith.constant 0.000000e+00 : f32
    %15 = vector.broadcast %cst_13 : f32 to vector<8x256xf32>
    %16 = arith.maximumf %14, %15 : vector<8x256xf32>
    %c0_14 = arith.constant 0 : index
    %c0_15 = arith.constant 0 : index
    %17 = vector.load %arg7[%c0_14, %c0_15] : memref<4x8xf32, #tpu.memory_space<vmem>>, vector<4x8xf32>
    %cst_16 = arith.constant dense<0.000000e+00> : vector<4x256xf32>
    %18 = tpu.matmul %17, %16, %cst_16 {dimension_numbers = #tpu.dot_dimension_numbers<[1], [0], [0], [1], [0, 0, 1, 1], [], []>} : vector<4x8xf32>, vector<8x256xf32>, vector<4x256xf32> -> vector<4x256xf32>
    %c0_17 = arith.constant 0 : index
    %c0_18 = arith.constant 0 : index
    %19 = vector.load %arg8[%c0_17, %c0_18] : memref<4x1xf32, #tpu.memory_space<vmem>>, vector<4x1xf32>
    %20 = vector.broadcast %19 : vector<4x1xf32> to vector<4x256xf32>
    %21 = arith.addf %18, %20 : vector<4x256xf32>
    %22 = arith.addf %21, %1 : vector<4x256xf32>
    %c0_19 = arith.constant 0 : index
    %c0_20 = arith.constant 0 : index
    %c0_21 = arith.constant 0 : index
    %23 = vector.load %arg9[%c0_19, %c0_20, %c0_21] : memref<1x4x256xf32, #tpu.memory_space<vmem>>, vector<1x4x256xf32>
    %24 = vector.shape_cast %23 : vector<1x4x256xf32> to vector<4x256xf32>
    %25 = vector.shape_cast %22 : vector<4x256xf32> to vector<1x4x256xf32>
    tpu.vector_store %arg9[%c0_19, %c0_20, %c0_21], %25 {strides = array<i32>} : memref<1x4x256xf32, #tpu.memory_space<vmem>>, vector<1x4x256xf32>,
    return
  }
  func.func @transform_0(%arg0: i32, %arg1: i32) -> (i32, i32, i32) {
    %c0_i32 = arith.constant 0 : i32
    %c0_i32_0 = arith.constant 0 : i32
    return %arg0, %c0_i32, %arg1 : i32, i32, i32
  }
  func.func @transform_1(%arg0: i32, %arg1: i32) -> (i32, i32, i32) {
    %c0_i32 = arith.constant 0 : i32
    %c0_i32_0 = arith.constant 0 : i32
    %c0_i32_1 = arith.constant 0 : i32
    return %arg0, %c0_i32, %c0_i32_0 : i32, i32, i32
  }
  func.func @transform_2(%arg0: i32, %arg1: i32) -> (i32, i32) {
    %c0_i32 = arith.constant 0 : i32
    %c0_i32_0 = arith.constant 0 : i32
    %c0_i32_1 = arith.constant 0 : i32
    return %c0_i32, %c0_i32_0 : i32, i32
  }
  func.func @transform_3(%arg0: i32, %arg1: i32) -> (i32, i32) {
    %c0_i32 = arith.constant 0 : i32
    %c0_i32_0 = arith.constant 0 : i32
    %c0_i32_1 = arith.constant 0 : i32
    return %c0_i32, %c0_i32_0 : i32, i32
  }
  func.func @transform_4(%arg0: i32, %arg1: i32) -> (i32, i32) {
    %c0_i32 = arith.constant 0 : i32
    %c0_i32_0 = arith.constant 0 : i32
    %c0_i32_1 = arith.constant 0 : i32
    return %c0_i32, %c0_i32_0 : i32, i32
  }
  func.func @transform_5(%arg0: i32, %arg1: i32) -> (i32, i32) {
    %c0_i32 = arith.constant 0 : i32
    %c0_i32_0 = arith.constant 0 : i32
    %c0_i32_1 = arith.constant 0 : i32
    return %c0_i32, %c0_i32_0 : i32, i32
  }
  func.func @transform_6(%arg0: i32, %arg1: i32) -> (i32, i32) {
    %c0_i32 = arith.constant 0 : i32
    %c0_i32_0 = arith.constant 0 : i32
    %c0_i32_1 = arith.constant 0 : i32
    return %c0_i32, %c0_i32_0 : i32, i32
  }
  func.func @transform_7(%arg0: i32, %arg1: i32) -> (i32, i32, i32) {
    %c0_i32 = arith.constant 0 : i32
    %c0_i32_0 = arith.constant 0 : i32
    return %arg0, %c0_i32, %arg1 : i32, i32, i32
  }
}

</mosaic_0001>

<bundles_post_ra>
// kernel: tpu_custom_call.1
= control target key start
LH: loop header
LB: loop body
LE: loop exit
PB: predicated region body
PF: predicated region fallthrough
CT: control target
= control target key end

     0   :  { %12 = vsyncpa [#allocation3], 0  ;;  %s946_s0 = inlined_call_operand.vmem [shape: f32[2,4,256], index: 0, kind: input, shape index: {}]   ;;  %s947_s1 = inlined_call_operand.vmem [shape: f32[2,8,1], index: 1, kind: input, shape index: {}]   ;;  %s948_s2 = inlined_call_operand.vmem [shape: f32[4,4], index: 2, kind: input, shape index: {}]   ;;  %s949_s3 = inlined_call_operand.vmem [shape: f32[4,1], index: 3, kind: input, shape index: {}]   ;;  %s950_s4 = inlined_call_operand.vmem [shape: f32[8,4], index: 4, kind: input, shape index: {}]   ;;  %s951_s5 = inlined_call_operand.vmem [shape: f32[4,8], index: 5, kind: input, shape index: {}]   ;;  %s952_s6 = inlined_call_operand.vmem [shape: f32[4,1], index: 6, kind: input, shape index: {}]   ;;  %s953_s7 = inlined_call_operand.hbm [shape: f32[2,4,256], index: 7, kind: output, shape index: {}]  }
   0x1   :  { %14 = vsyncpa [#allocation3 + $0x1], 0  ;;  %s822_s24 = smov 0   ;;  %s824_s25 = smov 0  }
   0x2   :  { %s826_s26 = smov 0   ;;  %s828_s27 = smov 0  }
   0x3   :  { %s830_s28 = smov 0   ;;  %s832_s29 = smov 0  }
   0x4 LB: > { %s617_s30 = sadd.s32 4294967295, %s779_s29   ;;  %s618_s8 = sadd.s32 4294967294, %s779_s29   ;;  %s779_s29 = sphi %s832_s29, %s20_s29   ;;  %s775_s28 = sphi %s830_s28, %s960_s28   ;;  %s771_s27 = sphi %s828_s27, %s959_s27   ;;  %s767_s26 = sphi %s826_s26, %s958_s26   ;;  %s763_s25 = sphi %s824_s25, %s957_s25   ;;  %s759_s24 = sphi %s822_s24, %s956_s24  }
   0x5   : > { %s32_s9 = sadd.s32 1, %s775_s28  ;;  %s200_s10 = sadd.s32 1, %s767_s26 }
   0x6   : > { %p34_p0 = scmp.ge.s32.totalorder %s32_s9, 2  ;;  %p210_p1 = scmp.ne.s32.totalorder %s767_s26, %s763_s25 }
   0x7   : > { %p211_p2 = scmp.eq.s32.totalorder %s617_s30, 1  ;;  %p216_p3 = scmp.ne.s32.totalorder %s763_s25, %s759_s24 }
   0x8   : > { %s962_s9 = smov (%p34_p0, %s32_s9), 0  ;;  %p217_p5 = scmp.eq.s32.totalorder %s618_s8, 1 }
   0x9   : > { %p862_p4 = por %p211_p2, %p210_p1  ;;  %s195_s12 = ssub.s32 %s775_s28, %s962_s9 }
   0xa   : > { %p621_p6 = scmp.ge.s32.totalorder %s779_s29, 1  ;;  %p198_p7 = scmp.eq.s32.totalorder %s195_s12, 0 }
   0xb   : > { %p869_p8 = por %p217_p5, %p216_p3  ;;  %p270_p9 = scmp.lt.s32.totalorder %s779_s29, 3 }
   0xc   : > { %s875_s14 = scalar_select %p198_p7, %s767_s26, %s200_s10  }
   0xd   : > { %p271_p10 = pnand %p621_p6, %p270_p9 }
   0xe   : > { %p311_p11 = scmp.lt.s32.totalorder (!%p271_p10), %s771_s27, 1  ;;  %s307_s20 = sand.u32 (!%p271_p10), 1, %s763_s25  }
   0xf   : > { %274 = sbr.rel (%p271_p10) target bundleno = 438 (0x1b6), region = 48  ;;  %s642_s22 = sshll.u32 (!%p271_p10), %s771_s27, 3 }
  0x10   : > { %s524_s8 = scalar_lea.hbm (!%p271_p10), %s953_s7, %s642_s22 }
  0x11   : > { %s528_s15 = sshll.u32 (!%p271_p10), %s524_s8, 4  ;;  %s529_s15 = int_to_ptr.hbm [resolvable:$true] %s528_s15 }
  0x12   : > { %s715_s16 = sshra.s32 (!%p271_p10), %s529_s15, 4  ;;  %s716_s16 = int_to_ptr.hbm [resolvable:$true] %s715_s16 }
  0x13   : > { %p722_p1 = scmp.lt.s32.totalorder (!%p271_p10), %s716_s16, %s953_s7 }
  0x14   : > { %v781_v0 = vmov 0   ;;  %v327_v1 = vld [vmem:[%s949_s3] sm:$0xf]  ;;  %s312_s17 = scalar_select %p311_p11, %s771_s27, 1  ;;  %vm341_vm0 = vcmask 1043456   ;;  %vm337_vm1 = vcmask 31744  }
  0x15   : > { %699 = vset.pattern.permute.xlu0 %v781_v0  ;;  %700 = vset.pattern.permute.xlu1 %v781_v0  ;;  %v326_v4 = vld [vmem:[%s948_s2] sm:$0xf]  ;;  %vm453_vm2 = vcmask 64512   ;;  %s511_s27 = scalar_lea.sflag [#allocation3], %s307_s20 }
  0x16   : > { %330 = vperm.xlu0 %699, %v327_v1   ;;  %s641_s18 = sshll.u32 %s312_s17, 3  ;;  %v388_v14 = vld [vmem:[%s950_s4] sm:$0xff]  ;;  %s717_s17 = scalar_lea.hbm %s716_s16, 8 }
  0x17   : > { %s318_s21 = scalar_lea.vmem %s946_s0, %s641_s18  ;;  %s323_s30 = scalar_lea.vmem %s947_s1, %s641_s18  ;;  %v447_v15 = vld [vmem:[%s952_s6] sm:$0xf] }
  0x18   : > { %v325_v2 = vld [vmem:[%s318_s21] sm:$0xff]  ;;  %450 = vperm.xlu1 %700, %v447_v15   ;;  %s622_s21 = sshll.u32 %s307_s20, 3  ;;  %p718_p12 = scmp.ne.s32.totalorder %s716_s16, %s717_s17 }
  0x19   : > { %334 = vst [vmem:[#allocation1] ss:$2 sm:$0xff] %v325_v2  ;;  %v389_v3 = vld [vmem:[%s323_s30] sm:$0xff]  ;;  %s309_s10 = scalar_lea.vmem [#allocation2], %s622_s21  ;;  %s721_s21 = scalar_lea.hbm %s953_s7, 16 }
  0x1a   : > { %v446_v23 = vld [vmem:[%s951_s5] sm:$0xf]  ;;  %s526_s12 = sshll.u32 %s309_s10, 4  ;;  %p719_p13 = pnand %p718_p12, %p862_p4  ;;  %s527_s12 = int_to_ptr.vmem [resolvable:$true] %s526_s12 }
  0x1b   : > { %p723_p2 = scmp.lt.s32.totalorder %s721_s21, %s717_s17 }
  0x1c   : > { %p720_p0 = pneg %p719_p13 }
  0x1d   : > { %p724_p3 = por %p723_p2, %p722_p1 }
  0x1e   : > { %392 = vperm.xlu0 %699, %v389_v3  }
  0x1f   : > { %p725_p5 = pnand %p724_p3, %p720_p0 }
  0x20   : > { %v335_v5 = vld.sshfl [vmem:[#allocation1] sm:$0xff pattern:$0x75316420]  ;;  %v336_v6 = vld.sshfl [vmem:[#allocation1 + $0x8] sm:$0xff pattern:$0x75316420] }
  0x21   : > { %626 = vmatpush.msk.msra.mxu0 %vm341_vm0, %v335_v5  ;;  %628 = vmatpush.msk.msra.mxu1 %vm341_vm0, %v336_v6  ;;  %497 = vst [vmem:[#allocation1] ss:$2 sm:$0xff] %v325_v2 }
  0x22   : > { %627 = vmatmul.msk.f32.vlgmr.msra.gmra.mxu0 %vm337_vm1, %v326_v4  ;;  %629 = vmatmul.msk.f32.vlgmr.msra.gmra.mxu1 %vm337_vm1, %v326_v4 }
  0x28   : > { %v499_v26 = vld.sshfl [vmem:[#allocation1 + $0x8] sm:$0xff pattern:$0x75316420]  ;;  %v498_v30 = vld.sshfl [vmem:[#allocation1] sm:$0xff pattern:$0x75316420] }
  0x88   : > { %v331_v7 = vpop.permute.xlu0 %330 }
  0x8a   : > { %v451_v24 = vpop.permute.xlu1 %450 }
  0x90   : > { %v393_v16 = vpop.permute.xlu0 %392 }
  0x9f   : > { %v363_v8 = vpop.f32.mrf.mxu0  ;;  %v383_v9 = vpop.f32.mrf.mxu1 }
  0xa0   : > { %v364_v10 = vadd.f32 %v363_v8, %v331_v7  ;;  %v384_v11 = vadd.f32 %v383_v9, %v331_v7 }
  0xa2   : > { %v386_v12 = vmax.f32 %v364_v10, 0.0  ;;  %v387_v13 = vmax.f32 %v384_v11, 0.0 }
  0xa4   : > { %630 = vmatpush.msk.msra.mxu2 %vm341_vm0, %v386_v12  ;;  %632 = vmatpush.msk.msra.mxu3 %vm341_vm0, %v387_v13 }
  0xa5   : > { %631 = vmatmul.msk.f32.vlgmr.msra.gmra.mxu2 %vm337_vm1, %v388_v14  ;;  %633 = vmatmul.msk.f32.vlgmr.msra.gmra.mxu3 %vm337_vm1, %v388_v14 }
 0x128   : > { %v421_v17 = vpop.f32.mrf.mxu2  ;;  %v441_v18 = vpop.f32.mrf.mxu3 }
 0x129   : > { %v422_v19 = vadd.f32 %v421_v17, %v393_v16  ;;  %v442_v20 = vadd.f32 %v441_v18, %v393_v16 }
 0x12b   : > { %v444_v21 = vmax.f32 %v422_v19, 0.0  ;;  %v445_v22 = vmax.f32 %v442_v20, 0.0 }
 0x12d   : > { %472 = vmatpush.msrb.mxu0 %v444_v21  ;;  %492 = vmatpush.msrb.mxu1 %v445_v22 }
 0x12e   : > { %635 = vmatmul.msk.f32.vlgmr.msrb.gmra.mxu1 %vm453_vm2, %v446_v23  ;;  %634 = vmatmul.msk.f32.vlgmr.msrb.gmra.mxu0 %vm453_vm2, %v446_v23 }
 0x1ab   : > { %v494_v25 = vpop.f32.mrf.mxu1  ;;  %v474_v27 = vpop.f32.mrf.mxu0 }
 0x1ac   : > { %v495_v28 = vadd.f32 %v494_v25, %v451_v24  ;;  %v475_v29 = vadd.f32 %v474_v27, %v451_v24 }
 0x1ae   : > { %v503_v31 = vadd.f32 %v499_v26, %v495_v28  ;;  %v502_v33 = vadd.f32 %v498_v30, %v475_v29 }
 0x1b0   : > { %v506_v32 = vrot.slane %v503_v31, 4 }
 0x1b2   : > { %v507_v34 = vsel %vm341_vm0, %v502_v33, %v506_v32 }
 0x1b3   : > { %509 = vst [vmem:[%s309_s10] sm:$0xff] %v507_v34 }
 0x1b4   : > { %728 = shalt.err (!%p725_p5)
}
 0x1b5   : > { %643 = dma.vmem_to_hbm [thread:$0]  (%p862_p4), %s527_s12, 128, %s529_s15, %s511_s27  }
 0x1b6 PF: > { %p649_p6 = scmp.ge.s32.totalorder %s779_s29, 2  ;;  %s540_s20 = sand.u32 1, %s759_s24  }
 0x1b7   : > { %s541_s30 = scalar_lea.sflag [#allocation3], %s540_s20 }
 0x1b8   : > { %p646_p7 = pnand %p649_p6, %p869_p8 }
 0x1ba   : > { %p647_p9 = pneg %p646_p7 }
 0x1bc   : > { %754 = dma.done.wait (%p647_p9), %s541_s30, 128  }
 0x1bd   : > { %756 = vsyncadd (%p647_p9), %s541_s30, 4294967168  ;;  %s20_s29 = sadd.s32 1, %s779_s29   ;;  %s956_s24 = smov %s763_s25 }
 0x1be   : > { %p17_p10 = scmp.ge.s32.totalorder %s20_s29, 4   ;;  %s957_s25 = smov %s767_s26 }
 0x1bf   : > { %s958_s26 = smov %s875_s14  ;;  %s959_s27 = smov %s775_s28 }
 0x1c0   : > { %s960_s28 = smov %s962_s9  ;;  %19 = sbr.rel (!%p17_p10) target bundleno = 4 (0x4), region = 86 }
 0x1c5   :  { %547 = vsyncpa [#allocation3], 1 }
 0x1c6   :  { %549 = vsyncpa [#allocation3 + $0x1], 1 }

</bundles_post_ra>
